<compile_context>
chip_gen: v6e
topology: v6e:2x2x1
jax: 0.10.0
libtpu: 0.0.40
codegen_flags: <defaults>
</compile_context>

<pallas_src>
from math import sqrt

import jax
import jax.numpy as jnp
from jax.experimental import pallas as pl
from jax.experimental.pallas import tpu as pltpu

# OGB bond feature dims (get_bond_feature_dims()) -- hard-coded, synthetic.
FULL_BOND_FEATURE_DIMS = [5, 6, 2]
NUM_FEATURES = len(FULL_BOND_FEATURE_DIMS)

# Row offsets of each sub-table inside the concatenated table.
_OFFSETS = []
_acc = 0
for _d in FULL_BOND_FEATURE_DIMS:
    _OFFSETS.append(_acc)
    _acc += _d
TOTAL_ROWS = _acc                          # 13
TOTAL_PAD = ((TOTAL_ROWS + 7) // 8) * 8    # pad rows to a sublane multiple -> 16

# Bit-packing of the per-edge feature codes into a single int32.
_BITS = 8                                  # 8 bits per code (dims are tiny)
_MASK = (1 << _BITS) - 1


def _bond_encoder_kernel(packed_ref, table_ref, out_ref):
    """packed_ref: [T, 1] int32 (bit-packed codes), table_ref: [TOTAL_PAD, Dp] f32,
    out_ref: [T, Dp] out_dtype."""
    packed = packed_ref[...]                                   # [T, 1] int32
    t = packed.shape[0]
    iota = jax.lax.broadcasted_iota(jnp.int32, (t, TOTAL_PAD), 1)
    multi_hot = jnp.zeros((t, TOTAL_PAD), jnp.float32)
    for f in range(NUM_FEATURES):                              # static, tiny loop
        code = (packed >> (_BITS * f)) & _MASK                 # [T, 1]
        multi_hot = multi_hot + (iota == code + _OFFSETS[f]).astype(jnp.float32)
    # Sum of embedding lookups == multi_hot @ concatenated_table  (MXU).
    out_ref[...] = jnp.dot(multi_hot, table_ref[...],
                           preferred_element_type=jnp.float32
                           ).astype(out_ref.dtype)


def init_bond_encoder_params(key, emb_dim):
    """Xavier-uniform init of each table (matching torch.nn.init.xavier_uniform_),
    concatenated to [TOTAL_ROWS, emb_dim] (unpadded parameters)."""
    tables = []
    for dim in FULL_BOND_FEATURE_DIMS:
        key, sub = jax.random.split(key)
        bound = sqrt(6.0 / (dim + emb_dim))
        tables.append(jax.random.uniform(sub, (dim, emb_dim), jnp.float32,
                                         minval=-bound, maxval=bound))
    return jnp.concatenate(tables, axis=0)                     # [TOTAL_ROWS, D]


def _choose_tile_edges(num_edges, d_pad, max_tile, vmem_budget_bytes):
    """Largest edge tile whose double-buffered blocks fit the VMEM budget."""
    table_bytes = 2 * TOTAL_PAD * d_pad * 4          # resident (double-buffered) table
    per_row = 2 * (d_pad * 4 + 4)                    # out block + packed-idx block, x2 buffers
    tile = max(8, (vmem_budget_bytes - table_bytes) // per_row)
    tile = min(tile, max_tile)
    if num_edges > 256:
        # keep the grid >= 2 steps so a v7x megacore can shard the parallel axis
        tile = min(tile, -(-num_edges // 2))
    tile = min(tile, max(num_edges, 8))
    return max(8, (tile // 8) * 8)


def bond_encoder(edge_attr, table, *, max_tile_edges=4096,
                 vmem_budget_bytes=12 << 20, out_dtype=jnp.float32):
    """edge_attr: [E, F] int, table: [TOTAL_ROWS, D] f32 -> [E, D] out_dtype."""
    e, f = edge_attr.shape
    assert f == NUM_FEATURES
    rows, d = table.shape
    assert rows == TOTAL_ROWS

    d_pad = ((d + 127) // 128) * 128                 # lane-dense output width
    tile = _choose_tile_edges(e, d_pad, max_tile_edges, vmem_budget_bytes)
    e_pad = -(-e // tile) * tile                     # pad E to a tile multiple

    # Pack the three small bond codes into one int32 per edge (lane-dense,
    # contiguous index DMA; decoded with shifts/masks inside the kernel).
    packed = jnp.zeros((e,), jnp.int32)
    for i in range(NUM_FEATURES):
        packed = packed | (edge_attr[:, i].astype(jnp.int32) << (_BITS * i))
    packed = jnp.pad(packed, (0, e_pad - e)).reshape(e_pad, 1)

    # Pad table rows to a sublane multiple and columns to a lane multiple.
    table_p = jnp.pad(table.astype(jnp.float32),
                      ((0, TOTAL_PAD - TOTAL_ROWS), (0, d_pad - d)))

    grid = (e_pad // tile,)
    out = pl.pallas_call(
        _bond_encoder_kernel,
        out_shape=jax.ShapeDtypeStruct((e_pad, d_pad), out_dtype),
        grid_spec=pltpu.PrefetchScalarGridSpec(
            num_scalar_prefetch=0,
            grid=grid,
            in_specs=[
                # packed indices: [tile, 1] (last dim == full array dim)
                pl.BlockSpec((tile, 1), lambda i: (i, 0)),
                # whole concatenated table; constant block index -> DMA'd once
                pl.BlockSpec((TOTAL_PAD, d_pad), lambda i: (0, 0)),
            ],
            out_specs=pl.BlockSpec((tile, d_pad), lambda i: (i, 0)),
        ),
        compiler_params=pltpu.CompilerParams(
            dimension_semantics=("parallel",)),
    )(packed, table_p)
    return out[:e, :d]


def bond_encoder_ref(edge_attr, table):
    """Pure-JAX reference: sum of per-feature embedding lookups."""
    out = jnp.zeros((edge_attr.shape[0], table.shape[1]), jnp.float32)
    for i in range(NUM_FEATURES):
        out = out + table[edge_attr[:, i] + _OFFSETS[i]]
    return out


def _make_edge_attr(key, num_edges):
    cols = []
    for dim in FULL_BOND_FEATURE_DIMS:
        key, sub = jax.random.split(key)
        cols.append(jax.random.randint(sub, (num_edges, 1), 0, dim, jnp.int32))
    return jnp.concatenate(cols, axis=1)             # [E, F] int32


if __name__ == "__main__":
    # TODO(synk): padding=True branch (padding_idx=0 rows + index shift for -1)
    # not exercised; only the default padding=False forward path is implemented.
    key = jax.random.PRNGKey(0)

    # Config 1: non-multiples everywhere (exercises E padding, D padding to 128,
    # multi-step grid, tail slice).
    k_tab1, k_idx1, k_tab2, k_idx2 = jax.random.split(key, 4)
    emb_dim1, num_edges1 = 32, 300
    table1 = init_bond_encoder_params(k_tab1, emb_dim1)
    edge_attr1 = _make_edge_attr(k_idx1, num_edges1)
    out1 = jax.block_until_ready(bond_encoder(edge_attr1, table1))
    ref1 = bond_encoder_ref(edge_attr1, table1)
    assert out1.shape == (num_edges1, emb_dim1)
    assert jnp.allclose(out1, ref1, atol=1e-5, rtol=1e-5), "mismatch vs reference (cfg1)"

    # Config 2: lane-dense emb_dim and a 2-step parallel grid (no padding needed).
    emb_dim2, num_edges2 = 128, 512
    table2 = init_bond_encoder_params(k_tab2, emb_dim2)
    edge_attr2 = _make_edge_attr(k_idx2, num_edges2)
    out2 = jax.block_until_ready(bond_encoder(edge_attr2, table2))
    ref2 = bond_encoder_ref(edge_attr2, table2)
    assert out2.shape == (num_edges2, emb_dim2)
    assert jnp.allclose(out2, ref2, atol=1e-5, rtol=1e-5), "mismatch vs reference (cfg2)"

    print("KERNEL_OK")
</pallas_src>

<mosaic_0001>
module attributes {stable_mosaic.version = 11 : i64} {
  func.func @_bond_encoder_kernel(%arg0: i32, %arg1: memref<144x1xi32, #tpu.memory_space<vmem>>, %arg2: memref<16x128xf32, #tpu.memory_space<vmem>>, %arg3: memref<144x128xf32, #tpu.memory_space<vmem>>) attributes {dimension_semantics = [#tpu.dimension_semantics<parallel>], iteration_bounds = array<i64: 3>, scalar_prefetch = 0 : i64, scratch_operands = 0 : i64, tpu.core_type = #tpu.core_type<tc>, window_params = [{transform_indices = @transform_0, window_bounds = array<i64: 144, 1>}, {pipeline_mode = #tpu.pipeline_mode<synchronous>, transform_indices = @transform_1, window_bounds = array<i64: 16, 128>}, {transform_indices = @transform_2, window_bounds = array<i64: 144, 128>}]} {
    %c0 = arith.constant 0 : index
    %c0_0 = arith.constant 0 : index
    %0 = vector.load %arg1[%c0, %c0_0] : memref<144x1xi32, #tpu.memory_space<vmem>>, vector<144x1xi32>
    %1 = tpu.iota {dimensions = array<i32: 1>} : vector<144x16xi32>
    %cst = arith.constant 0.000000e+00 : f32
    %2 = vector.broadcast %cst : f32 to vector<144x16xf32>
    %c0_i32 = arith.constant 0 : i32
    %3 = vector.broadcast %c0_i32 : i32 to vector<144x1xi32>
    %4 = arith.shrsi %0, %3 : vector<144x1xi32>
    %c255_i32 = arith.constant 255 : i32
    %5 = vector.broadcast %c255_i32 : i32 to vector<144x1xi32>
    %6 = arith.andi %4, %5 : vector<144x1xi32>
    %c0_i32_1 = arith.constant 0 : i32
    %7 = vector.broadcast %c0_i32_1 : i32 to vector<144x1xi32>
    %8 = arith.addi %6, %7 : vector<144x1xi32>
    %9 = vector.broadcast %8 : vector<144x1xi32> to vector<144x16xi32>
    %10 = arith.cmpi eq, %1, %9 : vector<144x16xi32>
    %11 = arith.extui %10 : vector<144x16xi1> to vector<144x16xi32>
    %12 = arith.sitofp %11 : vector<144x16xi32> to vector<144x16xf32>
    %13 = arith.addf %2, %12 : vector<144x16xf32>
    %c8_i32 = arith.constant 8 : i32
    %14 = vector.broadcast %c8_i32 : i32 to vector<144x1xi32>
    %15 = arith.shrsi %0, %14 : vector<144x1xi32>
    %c255_i32_2 = arith.constant 255 : i32
    %16 = vector.broadcast %c255_i32_2 : i32 to vector<144x1xi32>
    %17 = arith.andi %15, %16 : vector<144x1xi32>
    %c5_i32 = arith.constant 5 : i32
    %18 = vector.broadcast %c5_i32 : i32 to vector<144x1xi32>
    %19 = arith.addi %17, %18 : vector<144x1xi32>
    %20 = vector.broadcast %19 : vector<144x1xi32> to vector<144x16xi32>
    %21 = arith.cmpi eq, %1, %20 : vector<144x16xi32>
    %22 = arith.extui %21 : vector<144x16xi1> to vector<144x16xi32>
    %23 = arith.sitofp %22 : vector<144x16xi32> to vector<144x16xf32>
    %24 = arith.addf %13, %23 : vector<144x16xf32>
    %c16_i32 = arith.constant 16 : i32
    %25 = vector.broadcast %c16_i32 : i32 to vector<144x1xi32>
    %26 = arith.shrsi %0, %25 : vector<144x1xi32>
    %c255_i32_3 = arith.constant 255 : i32
    %27 = vector.broadcast %c255_i32_3 : i32 to vector<144x1xi32>
    %28 = arith.andi %26, %27 : vector<144x1xi32>
    %c11_i32 = arith.constant 11 : i32
    %29 = vector.broadcast %c11_i32 : i32 to vector<144x1xi32>
    %30 = arith.addi %28, %29 : vector<144x1xi32>
    %31 = vector.broadcast %30 : vector<144x1xi32> to vector<144x16xi32>
    %32 = arith.cmpi eq, %1, %31 : vector<144x16xi32>
    %33 = arith.extui %32 : vector<144x16xi1> to vector<144x16xi32>
    %34 = arith.sitofp %33 : vector<144x16xi32> to vector<144x16xf32>
    %35 = arith.addf %24, %34 : vector<144x16xf32>
    %c0_4 = arith.constant 0 : index
    %c0_5 = arith.constant 0 : index
    %36 = vector.load %arg2[%c0_4, %c0_5] : memref<16x128xf32, #tpu.memory_space<vmem>>, vector<16x128xf32>
    %cst_6 = arith.constant dense<0.000000e+00> : vector<144x128xf32>
    %37 = tpu.matmul %35, %36, %cst_6 {dimension_numbers = #tpu.dot_dimension_numbers<[1], [0], [0], [1], [0, 0, 1, 1], [], []>} : vector<144x16xf32>, vector<16x128xf32>, vector<144x128xf32> -> vector<144x128xf32>
    %c0_7 = arith.constant 0 : index
    %c0_8 = arith.constant 0 : index
    %38 = vector.load %arg3[%c0_7, %c0_8] : memref<144x128xf32, #tpu.memory_space<vmem>>, vector<144x128xf32>
    tpu.vector_store %arg3[%c0_7, %c0_8], %37 {strides = array<i32>} : memref<144x128xf32, #tpu.memory_space<vmem>>, vector<144x128xf32>,
    return
  }
  func.func @transform_0(%arg0: i32) -> (i32, i32) {
    %c0_i32 = arith.constant 0 : i32
    %c0_i32_0 = arith.constant 0 : i32
    return %arg0, %c0_i32 : i32, i32
  }
  func.func @transform_1(%arg0: i32) -> (i32, i32) {
    %c0_i32 = arith.constant 0 : i32
    %c0_i32_0 = arith.constant 0 : i32
    %c0_i32_1 = arith.constant 0 : i32
    return %c0_i32, %c0_i32_0 : i32, i32
  }
  func.func @transform_2(%arg0: i32) -> (i32, i32) {
    %c0_i32 = arith.constant 0 : i32
    %c0_i32_0 = arith.constant 0 : i32
    return %arg0, %c0_i32 : i32, i32
  }
}

</mosaic_0001>

<bundles_post_ra>
// kernel: tpu_custom_call.1
= control target key start
LH: loop header
LB: loop body
LE: loop exit
PB: predicated region body
PF: predicated region fallthrough
CT: control target
= control target key end

     0   :  { %7 = vsyncpa [#allocation3], 0  ;;  %s1519_s0 = inlined_call_operand.vmem [shape: s32[432,1], index: 0, kind: input, shape index: {}]   ;;  %s1520_s1 = inlined_call_operand.vmem [shape: f32[16,128], index: 1, kind: input, shape index: {}]   ;;  %s1521_s2 = inlined_call_operand.hbm [shape: f32[432,128], index: 2, kind: output, shape index: {}]  }
   0x1   :  { %9 = vsyncpa [#allocation3 + $0x1], 0  ;;  %s1239_s9 = smov 0   ;;  %s1241_s10 = smov 0  }
   0x2   :  { %s1243_s11 = smov 0   ;;  %s1245_s12 = smov 0  }
   0x3 LB: > { %s1260_s13 = sadd.s32 4294967295, %s1217_s12   ;;  %s975_s14 = sadd.s32 4294967294, %s1217_s12   ;;  %s1217_s12 = sphi %s1245_s12, %s1527_s12   ;;  %s1213_s11 = sphi %s1243_s11, %s1526_s11   ;;  %s1209_s10 = sphi %s1241_s10, %s1525_s10   ;;  %s1205_s9 = sphi %s1239_s9, %s1524_s9  }
   0x4   : > { %s1264_s15 = sadd.s32 1, %s1217_s12   ;;  %s69_s16 = sadd.s32 1, %s1213_s11 }
   0x5   : > { %s66_s17 = ssub.s32 %s1217_s12, %s1264_s15  ;;  %p79_p0 = scmp.ne.s32.totalorder %s1213_s11, %s1209_s10 }
   0x6   : > { %p67_p1 = scmp.eq.s32.totalorder %s66_s17, 0  ;;  %p80_p2 = scmp.eq.s32.totalorder %s1260_s13, 2 }
   0x7   : > { %p85_p3 = scmp.ne.s32.totalorder %s1209_s10, %s1205_s9  ;;  %p86_p4 = scmp.eq.s32.totalorder %s975_s14, 2 }
   0x8   : > { %s1275_s18 = scalar_select %p67_p1, %s1213_s11, %s69_s16  }
   0x9   : > { %p1277_p5 = por %p80_p2, %p79_p0  ;;  %p1281_p6 = por %p86_p4, %p85_p3 }
   0xa   : > { %p978_p7 = scmp.ge.s32.totalorder %s1217_s12, 1  ;;  %p116_p8 = scmp.lt.s32.totalorder %s1217_s12, 4 }
   0xc   : > { %p117_p9 = pnand %p978_p7, %p116_p8 }
   0xd   : > { %s138_s21 = smul.u32 (!%p117_p9), 18, %s1260_s13  ;;  %s135_s30 = sand.u32 (!%p117_p9), 1, %s1209_s10  }
   0xe   : > { %120 = sbr.rel (%p117_p9) target bundleno = 466 (0x1d2), region = 28  ;;  %s1221_s17 = smov (!%p117_p9), [#allocation2]  }
   0xf   : > { %p139_p10 = scmp.lt.s32.totalorder (!%p117_p9), %s138_s21, 53  ;;  %s1111_s3 = smul.u32 (!%p117_p9), 144, %s135_s30 }
  0x10   : > { %s1055_s5 = smul.u32 (!%p117_p9), 2304, %s1260_s13  ;;  %s1479_s13 = scalar_lea.sflag (!%p117_p9), [#allocation3], %s135_s30 }
  0x11   : > { %s1448_s4 = scalar_lea.vmem (!%p117_p9), [#allocation2], %s1111_s3 }
  0x12   : > { %s913_s6 = sshll.u32 (!%p117_p9), %s1448_s4, 4  ;;  %s1469_s14 = scalar_lea.hbm (!%p117_p9), %s1521_s2, %s1055_s5  ;;  %s1471_s6 = int_to_ptr.vmem [resolvable:$true] %s913_s6 }
  0x13   : > { %v1219_v0 = vmov 0   ;;  %s1529_s21 = smov (!%p139_p10, %s138_s21), 53  ;;  %v670_v25 = vld [vmem:[%s1520_s1 + $0x8] sm:$0xff]  ;;  %v669_v28 = vld [vmem:[%s1520_s1] sm:$0xff]  ;;  %vm671_vm6 = vcmask 130048   ;;  %s1157_s16 = scalar_lea.vmem %s1471_s6, 2304 }
  0x14   : > { %1156 = vset.pattern.permute.xlu1 %v1219_v0  ;;  %1155 = vset.pattern.permute.xlu0 %v1219_v0  ;;  %s979_s22 = sshll.u32 %s1529_s21, 3  ;;  %p1158_p11 = scmp.ne.s32.totalorder %s1471_s6, %s1157_s16 }
  0x15   : > { %s1291_s25 = scalar_lea.vmem %s1519_s0, %s979_s22  ;;  %1076 = vmatprep.subr.mxu0 %v670_v25  ;;  %1107 = vmatprep.subr.mxu1 %v670_v25  ;;  %s1161_s21 = sshll.u32 %s1221_s17, 4  ;;  %s1162_s21 = int_to_ptr.vmem [resolvable:$false] %s1161_s21 }
  0x16   : > { %v146_v1 = vld [vmem:[%s1291_s25 + $0x8] sm:$0xff]  ;;  %v145_v2 = vld [vmem:[%s1291_s25] sm:$0xff]  ;;  %v155_v3 = vld [vmem:[%s1291_s25 + $0x50] sm:$0xff]  ;;  %1077 = vmatpush3.msra.mxu0 %v670_v25  ;;  %1109 = vmatpush3.msra.mxu1 %v670_v25  ;;  %p1159_p12 = pnand %p1158_p11, %p1277_p5  ;;  %s1163_s22 = scalar_lea.vmem %s1162_s21, 4608 }
  0x17   : > { %v166_v4 = vand.u32 255, %v146_v1  ;;  %v165_v5 = vand.u32 255, %v145_v2  ;;  %v147_v6 = vld [vmem:[%s1291_s25 + $0x10] sm:$0xff]  ;;  %v310_v7 = vshra.s32 %v146_v1, 8  ;;  %v175_v8 = vand.u32 255, %v155_v3  ;;  %v156_v26 = vld [vmem:[%s1291_s25 + $0x58] sm:$0xff]  ;;  %1078 = vmatprep.subr.mxu0 %v669_v28  ;;  %1108 = vmatprep.subr.mxu1 %v669_v28  ;;  %p1164_p0 = scmp.lt.s32.totalorder %s1471_s6, %s1162_s21  ;;  %p1165_p1 = scmp.lt.s32.totalorder %s1163_s22, %s1157_s16 }
  0x18   : > { %v309_v9 = vshra.s32 %v145_v2, 8  ;;  %v167_v10 = vand.u32 255, %v147_v6  ;;  %v490_v12 = vshra.s32 %v146_v1, 16  ;;  %v489_v13 = vshra.s32 %v145_v2, 16  ;;  %v148_v27 = vld [vmem:[%s1291_s25 + $0x18] sm:$0xff]  ;;  %1079 = vmatpush3.msra.mxu0 %v669_v28  ;;  %1110 = vmatpush3.msra.mxu1 %v669_v28  ;;  %v157_v49 = vld [vmem:[%s1291_s25 + $0x60] sm:$0xff]  ;;  %p1160_p13 = pneg %p1159_p12 }
  0x19   : > { %187 = vperm.xlu1 %1156, %v166_v4   ;;  %184 = vperm.xlu0 %1155, %v165_v5   ;;  %v328_v11 = vand.u32 255, %v310_v7  ;;  %v319_v15 = vshra.s32 %v155_v3, 8  ;;  %v311_v16 = vshra.s32 %v147_v6, 8  ;;  %v320_v31 = vshra.s32 %v156_v26, 8  ;;  %v149_v50 = vld [vmem:[%s1291_s25 + $0x20] sm:$0xff]  ;;  %v158_v59 = vld [vmem:[%s1291_s25 + $0x68] sm:$0xff]  ;;  %p1166_p2 = por %p1165_p1, %p1164_p0 }
  0x1a   : > { %v327_v14 = vand.u32 255, %v309_v9  ;;  %v508_v19 = vand.u32 255, %v490_v12  ;;  %v507_v20 = vand.u32 255, %v489_v13  ;;  %v312_v32 = vshra.s32 %v148_v27, 8  ;;  %v150_v60 = vld [vmem:[%s1291_s25 + $0x28] sm:$0xff]  ;;  %v152_v28 = vld [vmem:[%s1291_s25 + $0x38] sm:$0xff] }
  0x1b   : > { %v346_v17 = vadd.s32 5, %v328_v11  ;;  %v337_v23 = vand.u32 255, %v319_v15  ;;  %v329_v24 = vand.u32 255, %v311_v16  ;;  %v176_v33 = vand.u32 255, %v156_v26  ;;  %p1167_p3 = pnand %p1166_p2, %p1160_p13 }
  0x1c   : > { %v345_v18 = vadd.s32 5, %v327_v14  ;;  %v526_v21 = vadd.s32 11, %v508_v19  ;;  %v525_v22 = vadd.s32 11, %v507_v20  ;;  %v168_v34 = vand.u32 255, %v148_v27 }
  0x1d   : > { %214 = vperm.xlu1 %1156, %v175_v8   ;;  %190 = vperm.xlu0 %1155, %v167_v10   ;;  %v355_v29 = vadd.s32 5, %v337_v23  ;;  %v347_v30 = vadd.s32 5, %v329_v24  ;;  %v338_v35 = vand.u32 255, %v320_v31  ;;  %v330_v36 = vand.u32 255, %v312_v32 }
  0x1e   : > { %v499_v37 = vshra.s32 %v155_v3, 16  ;;  %v491_v38 = vshra.s32 %v147_v6, 16  ;;  %v500_v39 = vshra.s32 %v156_v26, 16  ;;  %v492_v40 = vshra.s32 %v148_v27, 16  ;;  %v160_v27 = vld [vmem:[%s1291_s25 + $0x78] sm:$0xff] }
  0x1f   : > { %v356_v41 = vadd.s32 5, %v338_v35  ;;  %v348_v42 = vadd.s32 5, %v330_v36  ;;  %v321_v53 = vshra.s32 %v157_v49, 8  ;;  %v313_v54 = vshra.s32 %v149_v50, 8 }
  0x20   : > { %v517_v43 = vand.u32 255, %v499_v37  ;;  %v509_v44 = vand.u32 255, %v491_v38  ;;  %v518_v47 = vand.u32 255, %v500_v39  ;;  %v510_v48 = vand.u32 255, %v492_v40 }
  0x21   : > { %367 = vperm.xlu1 %1156, %v346_v17   ;;  %364 = vperm.xlu0 %1155, %v345_v18   ;;  %v177_v55 = vand.u32 255, %v157_v49  ;;  %v169_v56 = vand.u32 255, %v149_v50  ;;  %v339_v57 = vand.u32 255, %v321_v53  ;;  %v331_v58 = vand.u32 255, %v313_v54  ;;  %v159_v17 = vld [vmem:[%s1291_s25 + $0x70] sm:$0xff] }
  0x22   : > { %v535_v45 = vadd.s32 11, %v517_v43  ;;  %v527_v46 = vadd.s32 11, %v509_v44  ;;  %v536_v51 = vadd.s32 11, %v518_v47  ;;  %v528_v52 = vadd.s32 11, %v510_v48  ;;  %v151_v18 = vld [vmem:[%s1291_s25 + $0x30] sm:$0xff] }
  0x23   : > { %v357_v61 = vadd.s32 5, %v339_v57  ;;  %v349_v62 = vadd.s32 5, %v331_v58  ;;  %v322_v63 = vshra.s32 %v158_v59, 8  ;;  %v314_v0 = vshra.s32 %v150_v60, 8 }
  0x24   : > { %v178_v1 = vand.u32 255, %v158_v59  ;;  %v170_v2 = vand.u32 255, %v150_v60  ;;  %v501_v5 = vshra.s32 %v157_v49, 16  ;;  %v493_v6 = vshra.s32 %v149_v50, 16  ;;  %v161_v49 = vld [vmem:[%s1291_s25 + $0x80] sm:$0xff] }
  0x25   : > { %547 = vperm.xlu1 %1156, %v526_v21   ;;  %544 = vperm.xlu0 %1155, %v525_v22   ;;  %v340_v3 = vand.u32 255, %v322_v63  ;;  %v332_v4 = vand.u32 255, %v314_v0  ;;  %v502_v7 = vshra.s32 %v158_v59, 16  ;;  %v494_v8 = vshra.s32 %v150_v60, 16  ;;  %v153_v50 = vld [vmem:[%s1291_s25 + $0x40] sm:$0xff]  ;;  %v162_v59 = vld [vmem:[%s1291_s25 + $0x88] sm:$0xff] }
  0x26   : > { %v519_v11 = vand.u32 255, %v501_v5  ;;  %v511_v12 = vand.u32 255, %v493_v6  ;;  %v323_v21 = vshra.s32 %v159_v17, 8  ;;  %v315_v22 = vshra.s32 %v151_v18, 8  ;;  %v154_v60 = vld [vmem:[%s1291_s25 + $0x48] sm:$0xff] }
  0x27   : > { %v358_v9 = vadd.s32 5, %v340_v3  ;;  %v350_v10 = vadd.s32 5, %v332_v4  ;;  %v520_v15 = vand.u32 255, %v502_v7  ;;  %v512_v16 = vand.u32 255, %v494_v8 }
  0x28   : > { %v537_v13 = vadd.s32 11, %v519_v11  ;;  %v529_v14 = vadd.s32 11, %v511_v12  ;;  %v179_v23 = vand.u32 255, %v159_v17  ;;  %v171_v24 = vand.u32 255, %v151_v18 }
  0x29   : > { %394 = vperm.xlu1 %1156, %v355_v29   ;;  %370 = vperm.xlu0 %1155, %v347_v30   ;;  %v538_v19 = vadd.s32 11, %v520_v15  ;;  %v530_v20 = vadd.s32 11, %v512_v16  ;;  %v341_v25 = vand.u32 255, %v323_v21  ;;  %v333_v26 = vand.u32 255, %v315_v22 }
  0x2a   : > { %v324_v31 = vshra.s32 %v160_v27, 8  ;;  %v316_v32 = vshra.s32 %v152_v28, 8  ;;  %v503_v37 = vshra.s32 %v159_v17, 16  ;;  %v495_v38 = vshra.s32 %v151_v18, 16 }
  0x2b   : > { %v359_v29 = vadd.s32 5, %v341_v25  ;;  %v351_v30 = vadd.s32 5, %v333_v26  ;;  %v504_v39 = vshra.s32 %v160_v27, 16  ;;  %v496_v40 = vshra.s32 %v152_v28, 16 }
  0x2c   : > { %v342_v35 = vand.u32 255, %v324_v31  ;;  %v334_v36 = vand.u32 255, %v316_v32  ;;  %v521_v43 = vand.u32 255, %v503_v37  ;;  %v513_v44 = vand.u32 255, %v495_v38 }
  0x2d   : > { %217 = vperm.xlu1 %1156, %v176_v33   ;;  %193 = vperm.xlu0 %1155, %v168_v34   ;;  %v180_v33 = vand.u32 255, %v160_v27  ;;  %v172_v34 = vand.u32 255, %v152_v28  ;;  %v522_v47 = vand.u32 255, %v504_v39  ;;  %v514_v48 = vand.u32 255, %v496_v40 }
  0x2e   : > { %v325_v53 = vshra.s32 %v161_v49, 8  ;;  %v317_v54 = vshra.s32 %v153_v50, 8  ;;  %v326_v63 = vshra.s32 %v162_v59, 8  ;;  %v318_v0 = vshra.s32 %v154_v60, 8 }
  0x2f   : > { %v505_v5 = vshra.s32 %v161_v49, 16  ;;  %v497_v6 = vshra.s32 %v153_v50, 16  ;;  %v506_v7 = vshra.s32 %v162_v59, 16  ;;  %v498_v8 = vshra.s32 %v154_v60, 16 }
  0x30   : > { %v343_v57 = vand.u32 255, %v325_v53  ;;  %v335_v58 = vand.u32 255, %v317_v54  ;;  %v344_v3 = vand.u32 255, %v326_v63  ;;  %v336_v4 = vand.u32 255, %v318_v0 }
  0x31   : > { %397 = vperm.xlu1 %1156, %v356_v41   ;;  %373 = vperm.xlu0 %1155, %v348_v42   ;;  %v360_v41 = vadd.s32 5, %v342_v35  ;;  %v352_v42 = vadd.s32 5, %v334_v36  ;;  %v523_v11 = vand.u32 255, %v505_v5  ;;  %v515_v12 = vand.u32 255, %v497_v6 }
  0x32   : > { %v524_v15 = vand.u32 255, %v506_v7  ;;  %v516_v16 = vand.u32 255, %v498_v8  ;;  %v163_v21 = vlaneseq  ;;  %v1220_v27 = vmov 0.0  }
  0x34   : > { %v542_v17 = vadd.s32 11, %v524_v15  ;;  %v534_v18 = vadd.s32 11, %v516_v16 }
  0x35   : > { %574 = vperm.xlu1 %1156, %v535_v45   ;;  %550 = vperm.xlu0 %1155, %v527_v46   ;;  %v539_v45 = vadd.s32 11, %v521_v43  ;;  %v531_v46 = vadd.s32 11, %v513_v44 }
  0x39   : > { %577 = vperm.xlu1 %1156, %v536_v51   ;;  %553 = vperm.xlu0 %1155, %v528_v52   ;;  %v540_v51 = vadd.s32 11, %v522_v47  ;;  %v532_v52 = vadd.s32 11, %v514_v48 }
  0x3d   : > { %220 = vperm.xlu1 %1156, %v177_v55   ;;  %196 = vperm.xlu0 %1155, %v169_v56   ;;  %v181_v55 = vand.u32 255, %v161_v49  ;;  %v173_v56 = vand.u32 255, %v153_v50 }
  0x41   : > { %400 = vperm.xlu1 %1156, %v357_v61   ;;  %376 = vperm.xlu0 %1155, %v349_v62   ;;  %v361_v61 = vadd.s32 5, %v343_v57  ;;  %v353_v62 = vadd.s32 5, %v335_v58 }
  0x45   : > { %223 = vperm.xlu1 %1156, %v178_v1   ;;  %199 = vperm.xlu0 %1155, %v170_v2   ;;  %v182_v1 = vand.u32 255, %v162_v59  ;;  %v174_v2 = vand.u32 255, %v154_v60 }
  0x49   : > { %403 = vperm.xlu1 %1156, %v358_v9   ;;  %379 = vperm.xlu0 %1155, %v350_v10   ;;  %v362_v9 = vadd.s32 5, %v344_v3  ;;  %v354_v10 = vadd.s32 5, %v336_v4 }
  0x4d   : > { %580 = vperm.xlu1 %1156, %v537_v13   ;;  %556 = vperm.xlu0 %1155, %v529_v14   ;;  %v541_v13 = vadd.s32 11, %v523_v11  ;;  %v533_v14 = vadd.s32 11, %v515_v12 }
  0x51   : > { %583 = vperm.xlu1 %1156, %v538_v19   ;;  %559 = vperm.xlu0 %1155, %v530_v20  }
  0x55   : > { %226 = vperm.xlu1 %1156, %v179_v23   ;;  %202 = vperm.xlu0 %1155, %v171_v24   ;;  %v1317_v24 = vand.u32 127, %v163_v21 }
  0x59   : > { %406 = vperm.xlu1 %1156, %v359_v29   ;;  %382 = vperm.xlu0 %1155, %v351_v30  }
  0x5d   : > { %229 = vperm.xlu1 %1156, %v180_v33   ;;  %205 = vperm.xlu0 %1155, %v172_v34  }
  0x61   : > { %409 = vperm.xlu1 %1156, %v360_v41   ;;  %385 = vperm.xlu0 %1155, %v352_v42  }
  0x65   : > { %586 = vperm.xlu1 %1156, %v539_v45   ;;  %562 = vperm.xlu0 %1155, %v531_v46  }
  0x69   : > { %589 = vperm.xlu1 %1156, %v540_v51   ;;  %565 = vperm.xlu0 %1155, %v532_v52  }
  0x6d   : > { %232 = vperm.xlu1 %1156, %v181_v55   ;;  %208 = vperm.xlu0 %1155, %v173_v56  }
  0x71   : > { %412 = vperm.xlu1 %1156, %v361_v61   ;;  %388 = vperm.xlu0 %1155, %v353_v62  }
  0x75   : > { %235 = vperm.xlu1 %1156, %v182_v1   ;;  %211 = vperm.xlu0 %1155, %v174_v2  }
  0x79   : > { %415 = vperm.xlu1 %1156, %v362_v9   ;;  %391 = vperm.xlu0 %1155, %v354_v10  }
  0x7d   : > { %592 = vperm.xlu1 %1156, %v541_v13   ;;  %568 = vperm.xlu0 %1155, %v533_v14  }
  0x81   : > { %595 = vperm.xlu1 %1156, %v542_v17   ;;  %571 = vperm.xlu0 %1155, %v534_v18  }
  0x94   : > { %v188_v19 = vpop.permute.xlu1 %187  ;;  %v185_v20 = vpop.permute.xlu0 %184 }
  0x95   : > { %vm238_vm0 = vcmp.eq.s32.totalorder %v1317_v24, %v188_v19  ;;  %vm237_vm1 = vcmp.eq.s32.totalorder %v1317_v24, %v185_v20 }
  0x96   : > { %v981_v30 = vsel %vm238_vm0, 1.0, %v1220_v27  ;;  %v980_v31 = vsel %vm237_vm1, 1.0, %v1220_v27 }
  0x98   : > { %v215_v22 = vpop.permute.xlu1 %214  ;;  %v191_v23 = vpop.permute.xlu0 %190 }
  0x99   : > { %vm247_vm9 = vcmp.eq.s32.totalorder %v1317_v24, %v215_v22  ;;  %vm239_vm10 = vcmp.eq.s32.totalorder %v1317_v24, %v191_v23 }
  0x9a   : > { %v990_v48 = vsel %vm247_vm9, 1.0, %v1220_v27  ;;  %v982_v49 = vsel %vm239_vm10, 1.0, %v1220_v27 }
  0x9c   : > { %v368_v25 = vpop.permute.xlu1 %367  ;;  %v365_v26 = vpop.permute.xlu0 %364 }
  0x9d   : > { %vm418_vm2 = vcmp.eq.s32.totalorder %v1317_v24, %v368_v25  ;;  %vm417_vm3 = vcmp.eq.s32.totalorder %v1317_v24, %v365_v26 }
  0x9e   : > { %v999_v28 = vsel %vm418_vm2, 1.0, %v1220_v27  ;;  %v998_v29 = vsel %vm417_vm3, 1.0, %v1220_v27 }
  0x9f   : > { %v472_v34 = vadd.f32 %v999_v28, %v981_v30  ;;  %v471_v35 = vadd.f32 %v998_v29, %v980_v31 }
  0xa0   : > { %v548_v32 = vpop.permute.xlu1 %547  ;;  %v545_v33 = vpop.permute.xlu0 %544 }
  0xa1   : > { %vm598_vm4 = vcmp.eq.s32.totalorder %v1317_v24, %v548_v32  ;;  %vm597_vm5 = vcmp.eq.s32.totalorder %v1317_v24, %v545_v33 }
  0xa2   : > { %v1017_v36 = vsel %vm598_vm4, 1.0, %v1220_v27  ;;  %v1016_v37 = vsel %vm597_vm5, 1.0, %v1220_v27 }
  0xa3   : > { %v652_v38 = vadd.f32 %v1017_v36, %v472_v34  ;;  %v651_v39 = vadd.f32 %v1016_v37, %v471_v35 }
  0xa4   : > { %v395_v40 = vpop.permute.xlu1 %394  ;;  %v371_v41 = vpop.permute.xlu0 %370 }
  0xa5   : > { %1080 = vmatprep.mubr.msk.f32.mxu0 %vm671_vm6, %v651_v39  ;;  %vm427_vm7 = vcmp.eq.s32.totalorder %v1317_v24, %v395_v40  ;;  %vm419_vm8 = vcmp.eq.s32.totalorder %v1317_v24, %v371_v41 }
  0xa6   : > { %1081 = vmatmul.mubr.msk.f32.vlgmr.msra.gmra.mxu0 %vm671_vm6, %v652_v38  ;;  %v1008_v46 = vsel %vm427_vm7, 1.0, %v1220_v27  ;;  %v1000_v47 = vsel %vm419_vm8, 1.0, %v1220_v27 }
  0xa7   : > { %v481_v50 = vadd.f32 %v1008_v46, %v990_v48  ;;  %v473_v51 = vadd.f32 %v1000_v47, %v982_v49 }
  0xa8   : > { %v218_v42 = vpop.permute.xlu1 %217  ;;  %v194_v43 = vpop.permute.xlu0 %193 }
  0xa9   : > { %vm248_vm13 = vcmp.eq.s32.totalorder %v1317_v24, %v218_v42  ;;  %vm240_vm14 = vcmp.eq.s32.totalorder %v1317_v24, %v194_v43 }
  0xaa   : > { %v991_v58 = vsel %vm248_vm13, 1.0, %v1220_v27  ;;  %v983_v61 = vsel %vm240_vm14, 1.0, %v1220_v27 }
  0xac   : > { %v398_v44 = vpop.permute.xlu1 %397  ;;  %v374_v45 = vpop.permute.xlu0 %373 }
  0xad   : > { %vm428_vm11 = vcmp.eq.s32.totalorder %v1317_v24, %v398_v44  ;;  %vm420_vm12 = vcmp.eq.s32.totalorder %v1317_v24, %v374_v45 }
  0xae   : > { %v1009_v54 = vsel %vm428_vm11, 1.0, %v1220_v27  ;;  %v1001_v55 = vsel %vm420_vm12, 1.0, %v1220_v27 }
  0xaf   : > { %v482_v62 = vadd.f32 %v1009_v54, %v991_v58  ;;  %v474_v1 = vadd.f32 %v1001_v55, %v983_v61 }
  0xb0   : > { %v575_v52 = vpop.permute.xlu1 %574  ;;  %v551_v53 = vpop.permute.xlu0 %550 }
  0xb1   : > { %vm607_vm15 = vcmp.eq.s32.totalorder %v1317_v24, %v575_v52  ;;  %vm599_vm0 = vcmp.eq.s32.totalorder %v1317_v24, %v551_v53 }
  0xb2   : > { %v1026_v56 = vsel %vm607_vm15, 1.0, %v1220_v27  ;;  %v1018_v57 = vsel %vm599_vm0, 1.0, %v1220_v27 }
  0xb3   : > { %v653_v59 = vadd.f32 %v1018_v57, %v473_v51  ;;  %v661_v60 = vadd.f32 %v1026_v56, %v481_v50 }
  0xb4   : > { %v578_v63 = vpop.permute.xlu1 %577  ;;  %v554_v0 = vpop.permute.xlu0 %553 }
  0xb5   : > { %vm608_vm1 = vcmp.eq.s32.totalorder %v1317_v24, %v578_v63  ;;  %vm600_vm2 = vcmp.eq.s32.totalorder %v1317_v24, %v554_v0  ;;  %1083 = vmatprep.mubr.msk.f32.mxu0 %vm671_vm6, %v653_v59  ;;  %1095 = vmatprep.mubr.msk.f32.mxu1 %vm671_vm6, %v661_v60 }
  0xb6   : > { %v1027_v2 = vsel %vm608_vm1, 1.0, %v1220_v27  ;;  %v1019_v3 = vsel %vm600_vm2, 1.0, %v1220_v27 }
  0xb7   : > { %v662_v4 = vadd.f32 %v1027_v2, %v482_v62  ;;  %v654_v5 = vadd.f32 %v1019_v3, %v474_v1 }
  0xb8   : > { %v221_v6 = vpop.permute.xlu1 %220  ;;  %v197_v7 = vpop.permute.xlu0 %196 }
  0xb9   : > { %1084 = vmatmul.mubr.msk.f32.gmra.mxu0 %vm671_vm6, %v654_v5  ;;  %1096 = vmatmul.mubr.msk.f32.vlgmr.msra.gmra.mxu1 %vm671_vm6, %v662_v4  ;;  %vm249_vm5 = vcmp.eq.s32.totalorder %v1317_v24, %v221_v6  ;;  %vm241_vm7 = vcmp.eq.s32.totalorder %v1317_v24, %v197_v7 }
  0xba   : > { %v992_v16 = vsel %vm249_vm5, 1.0, %v1220_v27  ;;  %v984_v17 = vsel %vm241_vm7, 1.0, %v1220_v27 }
  0xbc   : > { %v401_v8 = vpop.permute.xlu1 %400  ;;  %v377_v9 = vpop.permute.xlu0 %376 }
  0xbd   : > { %vm429_vm3 = vcmp.eq.s32.totalorder %v1317_v24, %v401_v8  ;;  %vm421_vm4 = vcmp.eq.s32.totalorder %v1317_v24, %v377_v9 }
  0xbe   : > { %v1010_v14 = vsel %vm429_vm3, 1.0, %v1220_v27  ;;  %v1002_v15 = vsel %vm421_vm4, 1.0, %v1220_v27 }
  0xbf   : > { %v483_v18 = vadd.f32 %v1010_v14, %v992_v16  ;;  %v475_v19 = vadd.f32 %v1002_v15, %v984_v17 }
  0xc0   : > { %v224_v10 = vpop.permute.xlu1 %223  ;;  %v200_v11 = vpop.permute.xlu0 %199 }
  0xc1   : > { %vm250_vm10 = vcmp.eq.s32.totalorder %v1317_v24, %v224_v10  ;;  %vm242_vm11 = vcmp.eq.s32.totalorder %v1317_v24, %v200_v11 }
  0xc2   : > { %v993_v28 = vsel %vm250_vm10, 1.0, %v1220_v27  ;;  %v985_v31 = vsel %vm242_vm11, 1.0, %v1220_v27 }
  0xc4   : > { %v404_v12 = vpop.permute.xlu1 %403  ;;  %v380_v13 = vpop.permute.xlu0 %379 }
  0xc5   : > { %vm430_vm8 = vcmp.eq.s32.totalorder %v1317_v24, %v404_v12  ;;  %vm422_vm9 = vcmp.eq.s32.totalorder %v1317_v24, %v380_v13 }
  0xc6   : > { %v1011_v22 = vsel %vm430_vm8, 1.0, %v1220_v27  ;;  %v1003_v23 = vsel %vm422_vm9, 1.0, %v1220_v27 }
  0xc7   : > { %v484_v32 = vadd.f32 %v1011_v22, %v993_v28  ;;  %v476_v35 = vadd.f32 %v1003_v23, %v985_v31 }
  0xc8   : > { %v581_v20 = vpop.permute.xlu1 %580  ;;  %v557_v21 = vpop.permute.xlu0 %556 }
  0xc9   : > { %vm609_vm12 = vcmp.eq.s32.totalorder %v1317_v24, %v581_v20  ;;  %vm601_vm13 = vcmp.eq.s32.totalorder %v1317_v24, %v557_v21 }
  0xca   : > { %v1028_v25 = vsel %vm609_vm12, 1.0, %v1220_v27  ;;  %v1020_v26 = vsel %vm601_vm13, 1.0, %v1220_v27 }
  0xcb   : > { %v663_v29 = vadd.f32 %v1028_v25, %v483_v18  ;;  %v655_v30 = vadd.f32 %v1020_v26, %v475_v19 }
  0xcc   : > { %v584_v33 = vpop.permute.xlu1 %583  ;;  %v560_v34 = vpop.permute.xlu0 %559 }
  0xcd   : > { %vm610_vm14 = vcmp.eq.s32.totalorder %v1317_v24, %v584_v33  ;;  %vm602_vm15 = vcmp.eq.s32.totalorder %v1317_v24, %v560_v34  ;;  %1086 = vmatprep.mubr.msk.f32.mxu0 %vm671_vm6, %v655_v30  ;;  %1098 = vmatprep.mubr.msk.f32.mxu1 %vm671_vm6, %v663_v29 }
  0xce   : > { %v1029_v36 = vsel %vm610_vm14, 1.0, %v1220_v27  ;;  %v1021_v37 = vsel %vm602_vm15, 1.0, %v1220_v27 }
  0xcf   : > { %v664_v38 = vadd.f32 %v1029_v36, %v484_v32  ;;  %v656_v39 = vadd.f32 %v1021_v37, %v476_v35 }
  0xd0   : > { %v227_v40 = vpop.permute.xlu1 %226  ;;  %v203_v41 = vpop.permute.xlu0 %202 }
  0xd1   : > { %1087 = vmatmul.mubr.msk.f32.gmra.mxu0 %vm671_vm6, %v656_v39  ;;  %1099 = vmatmul.mubr.msk.f32.gmra.mxu1 %vm671_vm6, %v664_v38  ;;  %vm251_vm2 = vcmp.eq.s32.totalorder %v1317_v24, %v227_v40  ;;  %vm243_vm3 = vcmp.eq.s32.totalorder %v1317_v24, %v203_v41 }
  0xd2   : > { %v994_v50 = vsel %vm251_vm2, 1.0, %v1220_v27  ;;  %v986_v51 = vsel %vm243_vm3, 1.0, %v1220_v27 }
  0xd4   : > { %v407_v42 = vpop.permute.xlu1 %406  ;;  %v383_v43 = vpop.permute.xlu0 %382 }
  0xd5   : > { %vm431_vm0 = vcmp.eq.s32.totalorder %v1317_v24, %v407_v42  ;;  %vm423_vm1 = vcmp.eq.s32.totalorder %v1317_v24, %v383_v43 }
  0xd6   : > { %v1012_v48 = vsel %vm431_vm0, 1.0, %v1220_v27  ;;  %v1004_v49 = vsel %vm423_vm1, 1.0, %v1220_v27 }
  0xd7   : > { %v485_v52 = vadd.f32 %v1012_v48, %v994_v50  ;;  %v477_v53 = vadd.f32 %v1004_v49, %v986_v51 }
  0xd8   : > { %v230_v44 = vpop.permute.xlu1 %229  ;;  %v206_v45 = vpop.permute.xlu0 %205 }
  0xd9   : > { %vm252_vm7 = vcmp.eq.s32.totalorder %v1317_v24, %v230_v44  ;;  %vm244_vm8 = vcmp.eq.s32.totalorder %v1317_v24, %v206_v45 }
  0xda   : > { %v995_v60 = vsel %vm252_vm7, 1.0, %v1220_v27  ;;  %v987_v63 = vsel %vm244_vm8, 1.0, %v1220_v27 }
  0xdc   : > { %v410_v46 = vpop.permute.xlu1 %409  ;;  %v386_v47 = vpop.permute.xlu0 %385 }
  0xdd   : > { %vm432_vm4 = vcmp.eq.s32.totalorder %v1317_v24, %v410_v46  ;;  %vm424_vm5 = vcmp.eq.s32.totalorder %v1317_v24, %v386_v47 }
  0xde   : > { %v1013_v56 = vsel %vm432_vm4, 1.0, %v1220_v27  ;;  %v1005_v57 = vsel %vm424_vm5, 1.0, %v1220_v27 }
  0xdf   : > { %v486_v0 = vadd.f32 %v1013_v56, %v995_v60  ;;  %v478_v3 = vadd.f32 %v1005_v57, %v987_v63 }
  0xe0   : > { %v587_v54 = vpop.permute.xlu1 %586  ;;  %v563_v55 = vpop.permute.xlu0 %562 }
  0xe1   : > { %vm611_vm9 = vcmp.eq.s32.totalorder %v1317_v24, %v587_v54  ;;  %vm603_vm10 = vcmp.eq.s32.totalorder %v1317_v24, %v563_v55 }
  0xe2   : > { %v1030_v58 = vsel %vm611_vm9, 1.0, %v1220_v27  ;;  %v1022_v59 = vsel %vm603_vm10, 1.0, %v1220_v27 }
  0xe3   : > { %v665_v61 = vadd.f32 %v1030_v58, %v485_v52  ;;  %v657_v62 = vadd.f32 %v1022_v59, %v477_v53 }
  0xe4   : > { %v590_v1 = vpop.permute.xlu1 %589  ;;  %v566_v2 = vpop.permute.xlu0 %565 }
  0xe5   : > { %vm612_vm11 = vcmp.eq.s32.totalorder %v1317_v24, %v590_v1  ;;  %vm604_vm12 = vcmp.eq.s32.totalorder %v1317_v24, %v566_v2  ;;  %1089 = vmatprep.mubr.msk.f32.mxu0 %vm671_vm6, %v657_v62  ;;  %1101 = vmatprep.mubr.msk.f32.mxu1 %vm671_vm6, %v665_v61 }
  0xe6   : > { %v1031_v4 = vsel %vm612_vm11, 1.0, %v1220_v27  ;;  %v1023_v5 = vsel %vm604_vm12, 1.0, %v1220_v27 }
  0xe7   : > { %v666_v6 = vadd.f32 %v1031_v4, %v486_v0  ;;  %v658_v7 = vadd.f32 %v1023_v5, %v478_v3 }
  0xe8   : > { %v233_v8 = vpop.permute.xlu1 %232  ;;  %v209_v9 = vpop.permute.xlu0 %208 }
  0xe9   : > { %1090 = vmatmul.mubr.msk.f32.gmra.mxu0 %vm671_vm6, %v658_v7  ;;  %1102 = vmatmul.mubr.msk.f32.gmra.mxu1 %vm671_vm6, %v666_v6  ;;  %vm253_vm15 = vcmp.eq.s32.totalorder %v1317_v24, %v233_v8  ;;  %vm245_vm0 = vcmp.eq.s32.totalorder %v1317_v24, %v209_v9 }
  0xea   : > { %v996_v18 = vsel %vm253_vm15, 1.0, %v1220_v27  ;;  %v988_v19 = vsel %vm245_vm0, 1.0, %v1220_v27 }
  0xec   : > { %v413_v10 = vpop.permute.xlu1 %412  ;;  %v389_v11 = vpop.permute.xlu0 %388 }
  0xed   : > { %vm433_vm13 = vcmp.eq.s32.totalorder %v1317_v24, %v413_v10  ;;  %vm425_vm14 = vcmp.eq.s32.totalorder %v1317_v24, %v389_v11 }
  0xee   : > { %v1014_v16 = vsel %vm433_vm13, 1.0, %v1220_v27  ;;  %v1006_v17 = vsel %vm425_vm14, 1.0, %v1220_v27 }
  0xef   : > { %v487_v20 = vadd.f32 %v1014_v16, %v996_v18  ;;  %v479_v21 = vadd.f32 %v1006_v17, %v988_v19 }
  0xf0   : > { %v236_v12 = vpop.permute.xlu1 %235  ;;  %v212_v13 = vpop.permute.xlu0 %211 }
  0xf1   : > { %vm254_vm3 = vcmp.eq.s32.totalorder %v1317_v24, %v236_v12  ;;  %vm246_vm4 = vcmp.eq.s32.totalorder %v1317_v24, %v212_v13 }
  0xf2   : > { %v997_v30 = vsel %vm254_vm3, 1.0, %v1220_v27  ;;  %v989_v33 = vsel %vm246_vm4, 1.0, %v1220_v27 }
  0xf4   : > { %v416_v14 = vpop.permute.xlu1 %415  ;;  %v392_v15 = vpop.permute.xlu0 %391 }
  0xf5   : > { %vm434_vm1 = vcmp.eq.s32.totalorder %v1317_v24, %v416_v14  ;;  %vm426_vm2 = vcmp.eq.s32.totalorder %v1317_v24, %v392_v15 }
  0xf6   : > { %v1015_v25 = vsel %vm434_vm1, 1.0, %v1220_v27  ;;  %v1007_v26 = vsel %vm426_vm2, 1.0, %v1220_v27 }
  0xf7   : > { %v488_v34 = vadd.f32 %v1015_v25, %v997_v30  ;;  %v480_v37 = vadd.f32 %v1007_v26, %v989_v33 }
  0xf8   : > { %v593_v22 = vpop.permute.xlu1 %592  ;;  %v569_v23 = vpop.permute.xlu0 %568 }
  0xf9   : > { %vm613_vm5 = vcmp.eq.s32.totalorder %v1317_v24, %v593_v22  ;;  %vm605_vm7 = vcmp.eq.s32.totalorder %v1317_v24, %v569_v23 }
  0xfa   : > { %v1032_v28 = vsel %vm613_vm5, 1.0, %v1220_v27  ;;  %v1024_v29 = vsel %vm605_vm7, 1.0, %v1220_v27 }
  0xfb   : > { %v667_v31 = vadd.f32 %v1032_v28, %v487_v20  ;;  %v659_v32 = vadd.f32 %v1024_v29, %v479_v21 }
  0xfc   : > { %v596_v35 = vpop.permute.xlu1 %595  ;;  %v572_v36 = vpop.permute.xlu0 %571 }
  0xfd   : > { %vm614_vm8 = vcmp.eq.s32.totalorder %v1317_v24, %v596_v35  ;;  %vm606_vm9 = vcmp.eq.s32.totalorder %v1317_v24, %v572_v36  ;;  %1092 = vmatprep.mubr.msk.f32.mxu0 %vm671_vm6, %v659_v32  ;;  %1104 = vmatprep.mubr.msk.f32.mxu1 %vm671_vm6, %v667_v31 }
  0xfe   : > { %v1033_v38 = vsel %vm614_vm8, 1.0, %v1220_v27  ;;  %v1025_v39 = vsel %vm606_vm9, 1.0, %v1220_v27 }
  0xff   : > { %v668_v40 = vadd.f32 %v1033_v38, %v488_v34  ;;  %v660_v41 = vadd.f32 %v1025_v39, %v480_v37 }
 0x101   : > { %1093 = vmatmul.mubr.msk.f32.gmra.mxu0 %vm671_vm6, %v660_v41  ;;  %1105 = vmatmul.mubr.msk.f32.gmra.mxu1 %vm671_vm6, %v668_v40 }
 0x166   : > { %v1082_v42 = vpop.f32.mrf.mxu0 }
 0x167   : > { %882 = vst [vmem:[%s1448_s4 + $0x8] sm:$0xff] %v1082_v42 }
 0x168   : > { %v792_v24 = vpop.f32.mrf.mxu0 }
 0x169   : > { %881 = vst [vmem:[%s1448_s4] sm:$0xff] %v792_v24 }
 0x179   : > { %v1085_v27 = vpop.f32.mrf.mxu0  ;;  %v1097_v43 = vpop.f32.mrf.mxu1 }
 0x17a   : > { %884 = vst [vmem:[%s1448_s4 + $0x18] sm:$0xff] %v1085_v27  ;;  %892 = vst [vmem:[%s1448_s4 + $0x58] sm:$0xff] %v1097_v43 }
 0x17b   : > { %v802_v44 = vpop.f32.mrf.mxu0  ;;  %v842_v45 = vpop.f32.mrf.mxu1 }
 0x17c   : > { %883 = vst [vmem:[%s1448_s4 + $0x10] sm:$0xff] %v802_v44  ;;  %891 = vst [vmem:[%s1448_s4 + $0x50] sm:$0xff] %v842_v45 }
 0x191   : > { %v1088_v46 = vpop.f32.mrf.mxu0  ;;  %v1100_v47 = vpop.f32.mrf.mxu1 }
 0x192   : > { %886 = vst [vmem:[%s1448_s4 + $0x28] sm:$0xff] %v1088_v46  ;;  %894 = vst [vmem:[%s1448_s4 + $0x68] sm:$0xff] %v1100_v47 }
 0x193   : > { %v812_v48 = vpop.f32.mrf.mxu0  ;;  %v852_v49 = vpop.f32.mrf.mxu1 }
 0x194   : > { %885 = vst [vmem:[%s1448_s4 + $0x20] sm:$0xff] %v812_v48  ;;  %893 = vst [vmem:[%s1448_s4 + $0x60] sm:$0xff] %v852_v49 }
 0x1a9   : > { %v1091_v50 = vpop.f32.mrf.mxu0  ;;  %v1103_v51 = vpop.f32.mrf.mxu1 }
 0x1aa   : > { %888 = vst [vmem:[%s1448_s4 + $0x38] sm:$0xff] %v1091_v50  ;;  %896 = vst [vmem:[%s1448_s4 + $0x78] sm:$0xff] %v1103_v51 }
 0x1ab   : > { %v822_v52 = vpop.f32.mrf.mxu0  ;;  %v862_v53 = vpop.f32.mrf.mxu1 }
 0x1ac   : > { %887 = vst [vmem:[%s1448_s4 + $0x30] sm:$0xff] %v822_v52  ;;  %895 = vst [vmem:[%s1448_s4 + $0x70] sm:$0xff] %v862_v53 }
 0x1c1   : > { %v1094_v54 = vpop.f32.mrf.mxu0  ;;  %v1106_v55 = vpop.f32.mrf.mxu1 }
 0x1c2   : > { %890 = vst [vmem:[%s1448_s4 + $0x48] sm:$0xff] %v1094_v54  ;;  %898 = vst [vmem:[%s1448_s4 + $0x88] sm:$0xff] %v1106_v55 }
 0x1c3   : > { %v832_v56 = vpop.f32.mrf.mxu0  ;;  %v872_v57 = vpop.f32.mrf.mxu1 }
 0x1c4   : > { %889 = vst [vmem:[%s1448_s4 + $0x40] sm:$0xff] %v832_v56  ;;  %897 = vst [vmem:[%s1448_s4 + $0x80] sm:$0xff] %v872_v57 }
 0x1c5   : > { %1170 = shalt.err (!%p1167_p3)
}
 0x1c6   : > { %s1171_s23 = scalar_lea.hbm %s1469_s14, 2304  ;;  %s1175_s26 = scalar_lea.hbm %s1521_s2, 6912 }
 0x1c7   : > { %p1172_p4 = scmp.ne.s32.totalorder %s1469_s14, %s1171_s23  ;;  %p1176_p9 = scmp.lt.s32.totalorder %s1469_s14, %s1521_s2 }
 0x1c8   : > { %p1177_p10 = scmp.lt.s32.totalorder %s1175_s26, %s1171_s23 }
 0x1c9   : > { %p1173_p7 = pnand %p1172_p4, %p1277_p5 }
 0x1ca   : > { %p1178_p11 = por %p1177_p10, %p1176_p9 }
 0x1cb   : > { %p1174_p8 = pneg %p1173_p7 }
 0x1cd   : > { %p1179_p12 = pnand %p1178_p11, %p1174_p8 }
 0x1cf   : > { %1182 = shalt.err (!%p1179_p12)
}
 0x1d0   : > { %s1222_s29 = smov 128   ;;  %s1223_s30 = smov 8  }
 0x1d1   : > { %1112 = dma.vmem_to_hbm [thread:$0]  (%p1277_p5), %s1471_s6, 2304, %s1469_s14, %s1479_s13, %s1222_s29, %s1222_s29, %s1223_s30  }
 0x1d2 PF: > { %p1118_p13 = scmp.ge.s32.totalorder %s1217_s12, 2  ;;  %s928_s3 = sand.u32 1, %s1205_s9  }
 0x1d3   : > { %s929_s4 = scalar_lea.sflag [#allocation3], %s928_s3 }
 0x1d4   : > { %p1115_p0 = pnand %p1118_p13, %p1281_p6 }
 0x1d6   : > { %p1116_p1 = pneg %p1115_p0 }
 0x1d8   : > { %1200 = dma.done.wait (%p1116_p1), %s929_s4, 2304  }
 0x1d9   : > { %1202 = vsyncadd (%p1116_p1), %s929_s4, 4294964992  ;;  %p12_p2 = scmp.ge.s32.totalorder %s1264_s15, 5   ;;  %s1524_s9 = smov %s1209_s10 }
 0x1da   : > { %s1525_s10 = smov %s1213_s11  ;;  %s1526_s11 = smov %s1275_s18 }
 0x1db   : > { %s1527_s12 = smov %s1264_s15  ;;  %14 = sbr.rel (!%p12_p2) target bundleno = 3 (0x3), region = 63 }
 0x1e0   :  { %934 = vsyncpa [#allocation3], 1 }
 0x1e1   :  { %936 = vsyncpa [#allocation3 + $0x1], 1 }

</bundles_post_ra>
